<compile_context>
chip_gen: v7x
topology: tpu7x:2x2x1
jax: 0.10.0
libtpu: 0.0.40
codegen_flags: <defaults>
</compile_context>

<pallas_src>
import jax
import jax.numpy as jnp
from jax.experimental import pallas as pl
from jax.experimental.pallas import tpu as pltpu


def _round_up(n, m):
    return ((n + m - 1) // m) * m


def policy_kernel(x_ref, pos_ref, w1a_ref, w1b_ref, b1_ref, wh_ref, bh_ref,
                  z_ref):
    cdt = w1a_ref.dtype
    # fc1 state part: (TB, S) @ (S, Hp) on the MXU with f32 accumulation.
    acc = jnp.dot(x_ref[...].astype(cdt), w1a_ref[...],
                  preferred_element_type=jnp.float32)
    # fc1 pos part (only 2 input features): two broadcast FMAs on the VPU.
    pos = pos_ref[...].astype(jnp.float32)                       # (TB, 2)
    acc = acc + pos[:, 0:1] * w1b_ref[0:1, :] + pos[:, 1:2] * w1b_ref[1:2, :]
    h = jnp.maximum(acc + b1_ref[...], 0.0).astype(cdt)          # ReLU
    # Fused heads: cols [0, act) = mean pre-act, [act, 2*act) = std pre-act.
    z = jnp.dot(h, wh_ref[...], preferred_element_type=jnp.float32) + bh_ref[...]
    z_ref[...] = z.astype(z_ref.dtype)


def prepare_params(params, state_dim, compute_dtype=jnp.bfloat16):
    """One-time: transpose, split, zero-pad and cast weights into kernel layout.

    PyTorch Linear stores weight as (out, in); the kernel uses (in, out).
    """
    w1, b1, wm, bm, ws, bs = (params[k] for k in ("w1", "b1", "wm", "bm", "ws", "bs"))
    hidden, in_dim = w1.shape
    pos_dim = in_dim - state_dim            # 2
    act = wm.shape[0]                       # 2
    assert pos_dim == 2, "kernel hard-codes the 2 pos columns"

    H_p = _round_up(hidden, 128)            # 128
    A_p = _round_up(2 * act, 128)           # 128 (both heads packed)

    w1a = jnp.zeros((state_dim, H_p), compute_dtype).at[:, :hidden].set(
        w1[:, :state_dim].T.astype(compute_dtype))
    # pos part of fc1 kept tiny and f32 (2 rows -> broadcast FMAs in-kernel).
    w1b = jnp.zeros((pos_dim, H_p), jnp.float32).at[:, :hidden].set(
        w1[:, state_dim:].T)
    b1p = jnp.zeros((1, H_p), jnp.float32).at[0, :hidden].set(b1)
    wh = (jnp.zeros((H_p, A_p), compute_dtype)
          .at[:hidden, :act].set(wm.T.astype(compute_dtype))
          .at[:hidden, act:2 * act].set(ws.T.astype(compute_dtype)))
    bh = (jnp.zeros((1, A_p), jnp.float32)
          .at[0, :act].set(bm)
          .at[0, act:2 * act].set(bs))
    return dict(w1a=w1a, w1b=w1b, b1=b1p, wh=wh, bh=bh,
                state_dim=state_dim, act=act, dims=(H_p, A_p),
                compute_dtype=compute_dtype)


def mlp_policy_forward(x, pos, prep, *, batch_tile=1024):
    """x: (B, state_dim) f32/bf16, pos: (B, 2) f32. Returns (mean, std) f32 (B, act)."""
    H_p, A_p = prep["dims"]
    act = prep["act"]
    B, S = x.shape
    assert S == prep["state_dim"] and pos.shape == (B, 2)

    # Batch tile: multiple of 16 (bf16 sublane packing), never larger than B
    # (the ragged tail block of the last grid step is masked by Pallas), split
    # into >=2 grid steps for mid-sized batches so both v7x TensorCores work.
    # batch_tile=1024 suits v5e/v6e; sweep ~2048 on v7x.
    if B < 8:
        TB = B                                    # block == full batch dim
    else:
        TB = min(batch_tile, _round_up(B, 16))
        if TB > B:
            TB = (B // 8) * 8
        if pl.cdiv(B, TB) == 1 and B >= 32:
            TB = min(TB, _round_up(pl.cdiv(B, 2), 16))
    nb = pl.cdiv(B, TB)

    flops = 2 * B * S * H_p + 4 * B * H_p + 2 * B * H_p * A_p
    bytes_acc = (x.size * x.dtype.itemsize + pos.size * pos.dtype.itemsize
                 + sum(prep[k].size * prep[k].dtype.itemsize
                       for k in ("w1a", "w1b", "b1", "wh", "bh"))
                 + B * A_p * 2)

    # Weight/bias specs have constant index_maps -> resident across grid steps.
    # (pl.Buffered(1) on them would free ~300 KiB VMEM; not needed at TB<=2048.)
    z = pl.pallas_call(
        policy_kernel,
        out_shape=jax.ShapeDtypeStruct((B, A_p), jnp.bfloat16),
        grid=(nb,),
        in_specs=[
            pl.BlockSpec((TB, S), lambda i: (i, 0)),       # x tile (streamed)
            pl.BlockSpec((TB, 2), lambda i: (i, 0)),       # pos tile (raw)
            pl.BlockSpec((S, H_p), lambda i: (0, 0)),      # w1a (resident)
            pl.BlockSpec((2, H_p), lambda i: (0, 0)),      # w1b (resident, f32)
            pl.BlockSpec((1, H_p), lambda i: (0, 0)),      # b1
            pl.BlockSpec((H_p, A_p), lambda i: (0, 0)),    # fused head weight
            pl.BlockSpec((1, A_p), lambda i: (0, 0)),      # fused head bias
        ],
        out_specs=pl.BlockSpec((TB, A_p), lambda i: (i, 0)),
        compiler_params=pltpu.CompilerParams(
            dimension_semantics=("parallel",)),
        cost_estimate=pl.CostEstimate(
            flops=flops, transcendentals=0, bytes_accessed=bytes_acc),
    )(x, pos, prep["w1a"], prep["w1b"], prep["b1"], prep["wh"], prep["bh"])

    # Tiny XLA epilogue on the real (B, act) columns only.
    zm = z[:, :act].astype(jnp.float32)
    zs = z[:, act:2 * act].astype(jnp.float32)
    return jnp.tanh(zm), jax.nn.softplus(zs) + 1e-5


def init_params(key, state_dim=1024, action_dim=2, hidden=100):
    """Deterministic init matching the PyTorch module's init scheme shapes."""
    in_dim = state_dim + 2
    k1, k2, k3, k4, k5, k6 = jax.random.split(key, 6)
    # kaiming normal (fan_in mode, gain sqrt(2)) for fc1 weight
    w1 = jax.random.normal(k1, (hidden, in_dim), jnp.float32) * jnp.sqrt(2.0 / in_dim)
    # xavier normal for the two heads
    wm = jax.random.normal(k2, (action_dim, hidden), jnp.float32) * jnp.sqrt(
        2.0 / (hidden + action_dim))
    ws = jax.random.normal(k3, (action_dim, hidden), jnp.float32) * jnp.sqrt(
        2.0 / (hidden + action_dim))
    # PyTorch Linear default bias: U(-1/sqrt(fan_in), 1/sqrt(fan_in))
    b1 = jax.random.uniform(k4, (hidden,), jnp.float32,
                            -1.0 / jnp.sqrt(in_dim), 1.0 / jnp.sqrt(in_dim))
    bm = jax.random.uniform(k5, (action_dim,), jnp.float32,
                            -1.0 / jnp.sqrt(hidden), 1.0 / jnp.sqrt(hidden))
    bs = jax.random.uniform(k6, (action_dim,), jnp.float32,
                            -1.0 / jnp.sqrt(hidden), 1.0 / jnp.sqrt(hidden))
    return dict(w1=w1, b1=b1, wm=wm, bm=bm, ws=ws, bs=bs)


def reference_forward(x, pos, p):
    xc = jnp.concatenate([x, pos], axis=1)
    h = jax.nn.relu(xc @ p["w1"].T + p["b1"])
    mean = jnp.tanh(h @ p["wm"].T + p["bm"])
    std = jax.nn.softplus(h @ p["ws"].T + p["bs"]) + 1e-5
    return mean, std


if __name__ == "__main__":
    key = jax.random.PRNGKey(0)
    kx, kp, kw = jax.random.split(key, 3)

    B, STATE_DIM, ACTION_DIM = 8, 1024, 2
    x = jax.random.normal(kx, (B, STATE_DIM), jnp.float32)
    pos = jax.random.normal(kp, (B, 2), jnp.float32)
    params = init_params(kw, STATE_DIM, ACTION_DIM)

    # One-time weight layout prep (transpose/split/pad/bf16-cast) off the hot path.
    prep = prepare_params(params, STATE_DIM)

    mean, std = mlp_policy_forward(x, pos, prep)
    jax.block_until_ready((mean, std))

    mean_ref, std_ref = reference_forward(x, pos, params)
    assert mean.shape == (B, ACTION_DIM) and std.shape == (B, ACTION_DIM)
    # bf16 weights/activations/output with f32 accumulation -> loosened tolerance.
    assert jnp.allclose(mean, mean_ref, atol=3e-2, rtol=3e-2)
    assert jnp.allclose(std, std_ref, atol=3e-2, rtol=3e-2)
    assert bool(jnp.all(std > 0))

    # Ragged-tail path: batch not a multiple of the tile / sublane count.
    B2 = 13
    x2 = jax.random.normal(jax.random.PRNGKey(1), (B2, STATE_DIM), jnp.float32)
    pos2 = jax.random.normal(jax.random.PRNGKey(2), (B2, 2), jnp.float32)
    mean2, std2 = mlp_policy_forward(x2, pos2, prep)
    jax.block_until_ready((mean2, std2))
    mean2_ref, std2_ref = reference_forward(x2, pos2, params)
    assert mean2.shape == (B2, ACTION_DIM) and std2.shape == (B2, ACTION_DIM)
    assert jnp.allclose(mean2, mean2_ref, atol=3e-2, rtol=3e-2)
    assert jnp.allclose(std2, std2_ref, atol=3e-2, rtol=3e-2)

    print("KERNEL_OK")
</pallas_src>

<mosaic_0001>
module attributes {stable_mosaic.version = 11 : i64} {
  func.func @policy_kernel(%arg0: i32, %arg1: memref<8x1024xf32, #tpu.memory_space<vmem>>, %arg2: memref<8x2xf32, #tpu.memory_space<vmem>>, %arg3: memref<1024x128xbf16, #tpu.memory_space<vmem>>, %arg4: memref<2x128xf32, #tpu.memory_space<vmem>>, %arg5: memref<1x128xf32, #tpu.memory_space<vmem>>, %arg6: memref<128x128xbf16, #tpu.memory_space<vmem>>, %arg7: memref<1x128xf32, #tpu.memory_space<vmem>>, %arg8: memref<8x128xbf16, #tpu.memory_space<vmem>>) attributes {dimension_semantics = [#tpu.dimension_semantics<parallel>], iteration_bounds = array<i64: 1>, scalar_prefetch = 0 : i64, scratch_operands = 0 : i64, tpu.core_type = #tpu.core_type<tc>, window_params = [{transform_indices = @transform_0, window_bounds = array<i64: 8, 1024>}, {transform_indices = @transform_1, window_bounds = array<i64: 8, 2>}, {pipeline_mode = #tpu.pipeline_mode<synchronous>, transform_indices = @transform_2, window_bounds = array<i64: 1024, 128>}, {pipeline_mode = #tpu.pipeline_mode<synchronous>, transform_indices = @transform_3, window_bounds = array<i64: 2, 128>}, {pipeline_mode = #tpu.pipeline_mode<synchronous>, transform_indices = @transform_4, window_bounds = array<i64: 1, 128>}, {pipeline_mode = #tpu.pipeline_mode<synchronous>, transform_indices = @transform_5, window_bounds = array<i64: 128, 128>}, {pipeline_mode = #tpu.pipeline_mode<synchronous>, transform_indices = @transform_6, window_bounds = array<i64: 1, 128>}, {transform_indices = @transform_7, window_bounds = array<i64: 8, 128>}]} {
    %c0 = arith.constant 0 : index
    %c0_0 = arith.constant 0 : index
    %0 = vector.load %arg1[%c0, %c0_0] : memref<8x1024xf32, #tpu.memory_space<vmem>>, vector<8x1024xf32>
    %1 = arith.truncf %0 : vector<8x1024xf32> to vector<8x1024xbf16>
    %c0_1 = arith.constant 0 : index
    %c0_2 = arith.constant 0 : index
    %2 = vector.load %arg3[%c0_1, %c0_2] : memref<1024x128xbf16, #tpu.memory_space<vmem>>, vector<1024x128xbf16>
    %cst = arith.constant dense<0.000000e+00> : vector<8x128xf32>
    %3 = tpu.matmul %1, %2, %cst {dimension_numbers = #tpu.dot_dimension_numbers<[1], [0], [0], [1], [0, 0, 1, 1], [], []>} : vector<8x1024xbf16>, vector<1024x128xbf16>, vector<8x128xf32> -> vector<8x128xf32>
    %c0_3 = arith.constant 0 : index
    %c0_4 = arith.constant 0 : index
    %4 = vector.load %arg2[%c0_3, %c0_4] : memref<8x2xf32, #tpu.memory_space<vmem>>, vector<8x2xf32>
    %5 = vector.extract_strided_slice %4 {offsets = [0, 0], sizes = [8, 1], strides = [1, 1]} : vector<8x2xf32> to vector<8x1xf32>
    %c0_5 = arith.constant 0 : index
    %c0_6 = arith.constant 0 : index
    %6 = vector.load %arg4[%c0_5, %c0_6] : memref<2x128xf32, #tpu.memory_space<vmem>>, vector<1x128xf32>
    %7 = vector.broadcast %5 : vector<8x1xf32> to vector<8x128xf32>
    %8 = vector.broadcast %6 : vector<1x128xf32> to vector<8x128xf32>
    %9 = arith.mulf %7, %8 : vector<8x128xf32>
    %10 = arith.addf %3, %9 : vector<8x128xf32>
    %11 = vector.extract_strided_slice %4 {offsets = [0, 1], sizes = [8, 1], strides = [1, 1]} : vector<8x2xf32> to vector<8x1xf32>
    %c1 = arith.constant 1 : index
    %c0_7 = arith.constant 0 : index
    %12 = vector.load %arg4[%c1, %c0_7] : memref<2x128xf32, #tpu.memory_space<vmem>>, vector<1x128xf32>
    %13 = vector.broadcast %11 : vector<8x1xf32> to vector<8x128xf32>
    %14 = vector.broadcast %12 : vector<1x128xf32> to vector<8x128xf32>
    %15 = arith.mulf %13, %14 : vector<8x128xf32>
    %16 = arith.addf %10, %15 : vector<8x128xf32>
    %c0_8 = arith.constant 0 : index
    %c0_9 = arith.constant 0 : index
    %17 = vector.load %arg5[%c0_8, %c0_9] : memref<1x128xf32, #tpu.memory_space<vmem>>, vector<1x128xf32>
    %18 = vector.broadcast %17 : vector<1x128xf32> to vector<8x128xf32>
    %19 = arith.addf %16, %18 : vector<8x128xf32>
    %cst_10 = arith.constant 0.000000e+00 : f32
    %20 = vector.broadcast %cst_10 : f32 to vector<8x128xf32>
    %21 = arith.maximumf %19, %20 : vector<8x128xf32>
    %22 = arith.truncf %21 : vector<8x128xf32> to vector<8x128xbf16>
    %c0_11 = arith.constant 0 : index
    %c0_12 = arith.constant 0 : index
    %23 = vector.load %arg6[%c0_11, %c0_12] : memref<128x128xbf16, #tpu.memory_space<vmem>>, vector<128x128xbf16>
    %cst_13 = arith.constant dense<0.000000e+00> : vector<8x128xf32>
    %24 = tpu.matmul %22, %23, %cst_13 {dimension_numbers = #tpu.dot_dimension_numbers<[1], [0], [0], [1], [0, 0, 1, 1], [], []>} : vector<8x128xbf16>, vector<128x128xbf16>, vector<8x128xf32> -> vector<8x128xf32>
    %c0_14 = arith.constant 0 : index
    %c0_15 = arith.constant 0 : index
    %25 = vector.load %arg7[%c0_14, %c0_15] : memref<1x128xf32, #tpu.memory_space<vmem>>, vector<1x128xf32>
    %26 = vector.broadcast %25 : vector<1x128xf32> to vector<8x128xf32>
    %27 = arith.addf %24, %26 : vector<8x128xf32>
    %28 = arith.truncf %27 : vector<8x128xf32> to vector<8x128xbf16>
    %c0_16 = arith.constant 0 : index
    %c0_17 = arith.constant 0 : index
    %29 = vector.load %arg8[%c0_16, %c0_17] : memref<8x128xbf16, #tpu.memory_space<vmem>>, vector<8x128xbf16>
    tpu.vector_store %arg8[%c0_16, %c0_17], %28 {strides = array<i32>} : memref<8x128xbf16, #tpu.memory_space<vmem>>, vector<8x128xbf16>,
    return
  }
  func.func @transform_0(%arg0: i32) -> (i32, i32) {
    %c0_i32 = arith.constant 0 : i32
    %c0_i32_0 = arith.constant 0 : i32
    return %arg0, %c0_i32 : i32, i32
  }
  func.func @transform_1(%arg0: i32) -> (i32, i32) {
    %c0_i32 = arith.constant 0 : i32
    %c0_i32_0 = arith.constant 0 : i32
    return %arg0, %c0_i32 : i32, i32
  }
  func.func @transform_2(%arg0: i32) -> (i32, i32) {
    %c0_i32 = arith.constant 0 : i32
    %c0_i32_0 = arith.constant 0 : i32
    %c0_i32_1 = arith.constant 0 : i32
    return %c0_i32, %c0_i32_0 : i32, i32
  }
  func.func @transform_3(%arg0: i32) -> (i32, i32) {
    %c0_i32 = arith.constant 0 : i32
    %c0_i32_0 = arith.constant 0 : i32
    %c0_i32_1 = arith.constant 0 : i32
    return %c0_i32, %c0_i32_0 : i32, i32
  }
  func.func @transform_4(%arg0: i32) -> (i32, i32) {
    %c0_i32 = arith.constant 0 : i32
    %c0_i32_0 = arith.constant 0 : i32
    %c0_i32_1 = arith.constant 0 : i32
    return %c0_i32, %c0_i32_0 : i32, i32
  }
  func.func @transform_5(%arg0: i32) -> (i32, i32) {
    %c0_i32 = arith.constant 0 : i32
    %c0_i32_0 = arith.constant 0 : i32
    %c0_i32_1 = arith.constant 0 : i32
    return %c0_i32, %c0_i32_0 : i32, i32
  }
  func.func @transform_6(%arg0: i32) -> (i32, i32) {
    %c0_i32 = arith.constant 0 : i32
    %c0_i32_0 = arith.constant 0 : i32
    %c0_i32_1 = arith.constant 0 : i32
    return %c0_i32, %c0_i32_0 : i32, i32
  }
  func.func @transform_7(%arg0: i32) -> (i32, i32) {
    %c0_i32 = arith.constant 0 : i32
    %c0_i32_0 = arith.constant 0 : i32
    return %arg0, %c0_i32 : i32, i32
  }
}

</mosaic_0001>

<bundles_post_ra>
// kernel: tpu_custom_call.1
= control target key start
LH: loop header
LB: loop body
LE: loop exit
PB: predicated region body
PF: predicated region fallthrough
CT: control target
= control target key end

     0   :  { %12 = vsyncpa [#allocation3], 0  ;;  %s1407_s0 = inlined_call_operand.hbm [shape: f32[8,1024], index: 0, kind: input, shape index: {}]   ;;  %s1408_s1 = inlined_call_operand.vmem [shape: f32[8,2], index: 1, kind: input, shape index: {}]   ;;  %s1409_s2 = inlined_call_operand.hbm [shape: bf16[1024,128], index: 2, kind: input, shape index: {}]   ;;  %s1410_s3 = inlined_call_operand.vmem [shape: f32[2,128], index: 3, kind: input, shape index: {}]   ;;  %s1411_s4 = inlined_call_operand.vmem [shape: f32[1,128], index: 4, kind: input, shape index: {}]   ;;  %s1412_s5 = inlined_call_operand.hbm [shape: bf16[128,128], index: 5, kind: input, shape index: {}]   ;;  %s1413_s6 = inlined_call_operand.vmem [shape: f32[1,128], index: 6, kind: input, shape index: {}]   ;;  %s1414_s7 = inlined_call_operand.hbm [shape: bf16[8,128], index: 7, kind: output, shape index: {}]  }
   0x1   :  { %13 = vsyncpa [#allocation6], 0 }
   0x2   :  { %14 = vsyncpa [#allocation4], 0  ;;  %s1288_s24 = smov [#allocation5]   ;;  %s1194_s28 = scalar_lea.hbm %s1409_s2, 8192 }
   0x3   :  { %s32_s25 = sshll.u32 %s1288_s24, 4  ;;  %p1195_p0 = scmp.ne.s32.totalorder %s1409_s2, %s1194_s28  ;;  %s33_s25 = int_to_ptr.vmem [resolvable:$true] %s32_s25 }
   0x4   :  { %p1198_p1 = scmp.lt.u32.totalorder %s1194_s28, %s1409_s2 }
   0x6   :  { %p1200_p2 = pnand %p1198_p1, %p1195_p0 }
   0x8   :  { %1203 = shalt.err (!%p1200_p2)
}
   0x9   :  { %s1204_s10 = scalar_lea.vmem %s33_s25, 8192  ;;  %p1209_p4 = scmp.lt.s32.totalorder %s33_s25, %s33_s25 }
   0xa   :  { %p1205_p3 = scmp.ne.s32.totalorder %s33_s25, %s1204_s10  ;;  %p1210_p5 = scmp.lt.s32.totalorder %s1204_s10, %s1204_s10 }
   0xc   :  { %p1211_p6 = por %p1210_p5, %p1209_p4 }
   0xe   :  { %p1212_p7 = pnand %p1211_p6, %p1205_p3 }
  0x10   :  { %1215 = shalt.err (!%p1212_p7)
}
  0x11   :  { %s1289_s11 = smov 64   ;;  %s1290_s12 = smov 4  }
  0x12   :  { %38 = dma.hbm_to_vmem [thread:$0]  %s1409_s2, 8192, %s33_s25, [#allocation6], %s1289_s11, %s1289_s11, %s1290_s12  }
  0x13   :  { %s1291_s15 = smov [#allocation2]   ;;  %s1292_s17 = smov [#allocation7]  }
  0x14   :  { %s21_s16 = sshll.u32 %s1291_s15, 4  ;;  %s48_s18 = sshll.u32 %s1292_s17, 4  ;;  %s22_s16 = int_to_ptr.vmem [resolvable:$true] %s21_s16  ;;  %s49_s18 = int_to_ptr.vmem [resolvable:$true] %s48_s18 }
  0x15   :  { %s1216_s21 = scalar_lea.hbm %s1407_s0, 1024 }
  0x16   :  { %p1217_p8 = scmp.ne.s32.totalorder %s1407_s0, %s1216_s21  ;;  %p1220_p9 = scmp.lt.u32.totalorder %s1216_s21, %s1407_s0 }
  0x18   :  { %p1222_p10 = pnand %p1220_p9, %p1217_p8 }
  0x1a   :  { %1225 = shalt.err (!%p1222_p10)
}
  0x1b   :  { %s1226_s2 = scalar_lea.vmem %s22_s16, 1024  ;;  %p1231_p12 = scmp.lt.s32.totalorder %s22_s16, %s22_s16 }
  0x1c   :  { %p1227_p11 = scmp.ne.s32.totalorder %s22_s16, %s1226_s2  ;;  %p1232_p13 = scmp.lt.s32.totalorder %s1226_s2, %s1226_s2 }
  0x1e   :  { %p1233_p0 = por %p1232_p13, %p1231_p12 }
  0x20   :  { %p1234_p1 = pnand %p1233_p0, %p1227_p11 }
  0x22   :  { %1237 = shalt.err (!%p1234_p1)
}
  0x23   :  { %24 = dma.hbm_to_vmem [thread:$0]  %s1407_s0, 1024, %s22_s16, [#allocation3]  }
  0x24   :  { %s1238_s30 = scalar_lea.hbm %s1412_s5, 1024 }
  0x25   :  { %p1239_p2 = scmp.ne.s32.totalorder %s1412_s5, %s1238_s30  ;;  %p1242_p3 = scmp.lt.u32.totalorder %s1238_s30, %s1412_s5 }
  0x27   :  { %p1244_p4 = pnand %p1242_p3, %p1239_p2 }
  0x29   :  { %1247 = shalt.err (!%p1244_p4)
}
  0x2a   :  { %s1248_s14 = scalar_lea.vmem %s49_s18, 1024  ;;  %p1253_p6 = scmp.lt.s32.totalorder %s49_s18, %s49_s18 }
  0x2b   :  { %p1249_p5 = scmp.ne.s32.totalorder %s49_s18, %s1248_s14  ;;  %p1254_p7 = scmp.lt.s32.totalorder %s1248_s14, %s1248_s14 }
  0x2d   :  { %p1255_p8 = por %p1254_p7, %p1253_p6 }
  0x2f   :  { %p1256_p9 = pnand %p1255_p8, %p1249_p5 }
  0x31   :  { %1259 = shalt.err (!%p1256_p9)
}
  0x32   :  { %54 = dma.hbm_to_vmem [thread:$0]  %s1412_s5, 1024, %s49_s18, [#allocation6], %s1289_s11, %s1289_s11, %s1290_s12  }
  0x33   :  { %1282 = dma.done.wait [#allocation3], 1024  }
  0x34   :  { %1283 = vsyncadd [#allocation3], 4294966272 }
  0x35   :  { %1284 = dma.done.wait [#allocation6], 9216  }
  0x36   :  { %1285 = vsyncadd [#allocation6], 4294958080  ;;  %v1293_v0 = vmov 0   ;;  %v1122_v1 = vld [vmem:[#allocation5 + $0x40] sm:$0xff]   ;;  %v1126_v5 = vld [vmem:[#allocation5 + $0x48] sm:$0xff]   ;;  %vm1296_vm0 = vmmov 0  }
  0x37   :  { %1120 = vset.pattern.permute.xlu0 %v1293_v0  ;;  %v1123_v2 = vld [vmem:[#allocation5 + $0xc0] sm:$0xff]   ;;  %993 = vmatprep.subr.bf16.mxu0 %v1122_v1  ;;  %v1127_v6 = vld [vmem:[#allocation5 + $0xc8] sm:$0xff]   ;;  %v1130_v9 = vld [vmem:[#allocation5 + $0x50] sm:$0xff]   ;;  %s1297_s21 = smov [#allocation8]  }
  0x38   :  { %v1124_v3 = vld [vmem:[#allocation5] sm:$0xff]   ;;  %1015 = vmatprep.subr.bf16.mxu1 %v1123_v2  ;;  %v1128_v7 = vld [vmem:[#allocation5 + $0x8] sm:$0xff]   ;;  %v1131_v10 = vld [vmem:[#allocation5 + $0xd0] sm:$0xff]   ;;  %s907_s22 = sshll.u32 %s1297_s21, 4  ;;  %s908_s22 = int_to_ptr.vmem [resolvable:$true] %s907_s22 }
  0x39   :  { %v1125_v4 = vld [vmem:[#allocation5 + $0x80] sm:$0xff]   ;;  %994 = vmatpush3.bf16.msra.mxu0 %v1124_v3  ;;  %v1129_v8 = vld [vmem:[#allocation5 + $0x88] sm:$0xff]   ;;  %v1132_v11 = vld [vmem:[#allocation5 + $0x10] sm:$0xff]   ;;  %p1265_p11 = scmp.lt.s32.totalorder %s908_s22, %s908_s22 }
  0x3a   :  { %1016 = vmatpush3.bf16.msra.mxu1 %v1125_v4  ;;  %995 = vmatprep.subr.bf16.mxu0 %v1126_v5  ;;  %v1133_v12 = vld [vmem:[#allocation5 + $0x90] sm:$0xff]   ;;  %v1134_v13 = vld [vmem:[#allocation5 + $0x58] sm:$0xff]   ;;  %v1138_v17 = vld [vmem:[#allocation5 + $0x60] sm:$0xff]  }
  0x3b   :  { %1017 = vmatprep.subr.bf16.mxu1 %v1127_v6  ;;  %v1135_v14 = vld [vmem:[#allocation5 + $0xd8] sm:$0xff]   ;;  %v1139_v18 = vld [vmem:[#allocation5 + $0xe0] sm:$0xff]   ;;  %v1142_v21 = vld [vmem:[#allocation5 + $0x68] sm:$0xff]  }
  0x3c   :  { %v1136_v15 = vld [vmem:[#allocation5 + $0x18] sm:$0xff]   ;;  %v1140_v19 = vld [vmem:[#allocation5 + $0x20] sm:$0xff]   ;;  %v1143_v22 = vld [vmem:[#allocation5 + $0xe8] sm:$0xff]  }
  0x3d   :  { %996 = vmatpush3.bf16.msra.mxu0 %v1128_v7  ;;  %v1137_v16 = vld [vmem:[#allocation5 + $0x98] sm:$0xff]   ;;  %v1141_v20 = vld [vmem:[#allocation5 + $0xa0] sm:$0xff]   ;;  %v1144_v23 = vld [vmem:[#allocation5 + $0x28] sm:$0xff]  }
  0x3e   :  { %1018 = vmatpush3.bf16.msra.mxu1 %v1129_v8  ;;  %997 = vmatprep.subr.bf16.mxu0 %v1130_v9  ;;  %v1145_v24 = vld [vmem:[#allocation5 + $0xa8] sm:$0xff]   ;;  %v1146_v25 = vld [vmem:[#allocation5 + $0x70] sm:$0xff]   ;;  %v1150_v29 = vld [vmem:[#allocation5 + $0x78] sm:$0xff]  }
  0x3f   :  { %1019 = vmatprep.subr.bf16.mxu1 %v1131_v10  ;;  %v1147_v26 = vld [vmem:[#allocation5 + $0xf0] sm:$0xff]   ;;  %v1151_v30 = vld [vmem:[#allocation5 + $0xf8] sm:$0xff]   ;;  %v68_v33 = vld [vmem:[#allocation2 + $0x8] sm:$0xff] }
  0x40   :  { %v1148_v27 = vld [vmem:[#allocation5 + $0x30] sm:$0xff]   ;;  %v1152_v31 = vld [vmem:[#allocation5 + $0x38] sm:$0xff]   ;;  %v67_v35 = vld [vmem:[#allocation2] sm:$0xff]  ;;  %v76_v36 = vpack.c.bf16 %v68_v33, %v68_v33 }
  0x41   :  { %998 = vmatpush3.bf16.msra.mxu0 %v1132_v11  ;;  %v1149_v28 = vld [vmem:[#allocation5 + $0xb0] sm:$0xff]   ;;  %v1153_v32 = vld [vmem:[#allocation5 + $0xb8] sm:$0xff]   ;;  %v75_v38 = vpack.c.bf16 %v67_v35, %v67_v35  ;;  %v1154_v41 = vld [vmem:[#allocation5 + $0x140] sm:$0xff]  }
  0x42   :  { %1020 = vmatpush3.bf16.msra.mxu1 %v1133_v12  ;;  %999 = vmatprep.subr.bf16.mxu0 %v1134_v13  ;;  %v70_v34 = vld [vmem:[#allocation2 + $0x18] sm:$0xff]  ;;  %v69_v39 = vld [vmem:[#allocation2 + $0x10] sm:$0xff]  ;;  %v1155_v42 = vld [vmem:[#allocation5 + $0x1c0] sm:$0xff]  }
  0x43   :  { %1021 = vmatprep.subr.bf16.mxu1 %v1135_v14  ;;  %v78_v37 = vpack.c.bf16 %v70_v34, %v70_v34  ;;  %v77_v40 = vpack.c.bf16 %v69_v39, %v69_v39  ;;  %639 = vmatprep.mubr.bf16.mxu0 %v76_v36  ;;  %v1156_v43 = vld [vmem:[#allocation5 + $0x100] sm:$0xff]   ;;  %v1158_v45 = vld [vmem:[#allocation5 + $0x148] sm:$0xff]   ;;  %v1162_v49 = vld [vmem:[#allocation5 + $0x150] sm:$0xff]  }
  0x44   :  { %v1157_v44 = vld [vmem:[#allocation5 + $0x180] sm:$0xff]   ;;  %v1159_v46 = vld [vmem:[#allocation5 + $0x1c8] sm:$0xff]   ;;  %v1163_v50 = vld [vmem:[#allocation5 + $0x1d0] sm:$0xff]  }
  0x45   :  { %1000 = vmatpush3.bf16.msra.mxu0 %v1136_v15  ;;  %679 = vmatprep.mubr.bf16.mxu1 %v78_v37  ;;  %v1160_v47 = vld [vmem:[#allocation5 + $0x108] sm:$0xff]   ;;  %v1164_v51 = vld [vmem:[#allocation5 + $0x110] sm:$0xff]   ;;  %v1166_v53 = vld [vmem:[#allocation5 + $0x158] sm:$0xff]  }
  0x46   :  { %1022 = vmatpush3.bf16.msra.mxu1 %v1137_v16  ;;  %1001 = vmatprep.subr.bf16.mxu0 %v1138_v17  ;;  %v1161_v48 = vld [vmem:[#allocation5 + $0x188] sm:$0xff]   ;;  %v1165_v52 = vld [vmem:[#allocation5 + $0x190] sm:$0xff]   ;;  %v1167_v54 = vld [vmem:[#allocation5 + $0x1d8] sm:$0xff]  }
  0x47   :  { %1023 = vmatprep.subr.bf16.mxu1 %v1139_v18  ;;  %v1168_v55 = vld [vmem:[#allocation5 + $0x118] sm:$0xff]   ;;  %v1170_v57 = vld [vmem:[#allocation5 + $0x160] sm:$0xff]   ;;  %v1174_v61 = vld [vmem:[#allocation5 + $0x168] sm:$0xff]   ;;  %v1294_v18 = vmov 1  }
  0x48   :  { %v1169_v56 = vld [vmem:[#allocation5 + $0x198] sm:$0xff]   ;;  %v1171_v58 = vld [vmem:[#allocation5 + $0x1e0] sm:$0xff]   ;;  %v1175_v62 = vld [vmem:[#allocation5 + $0x1e8] sm:$0xff]  }
  0x49   :  { %1002 = vmatpush3.bf16.msra.mxu0 %v1140_v19  ;;  %v1172_v59 = vld [vmem:[#allocation5 + $0x120] sm:$0xff]   ;;  %v1176_v63 = vld [vmem:[#allocation5 + $0x128] sm:$0xff]   ;;  %v1178_v1 = vld [vmem:[#allocation5 + $0x170] sm:$0xff]  }
  0x4a   :  { %1024 = vmatpush3.bf16.msra.mxu1 %v1141_v20  ;;  %1003 = vmatprep.subr.bf16.mxu0 %v1142_v21  ;;  %v1173_v60 = vld [vmem:[#allocation5 + $0x1a0] sm:$0xff]   ;;  %v1177_v0 = vld [vmem:[#allocation5 + $0x1a8] sm:$0xff]   ;;  %v1179_v2 = vld [vmem:[#allocation5 + $0x1f0] sm:$0xff]   ;;  %v1295_v20 = vmov 0.0  }
  0x4b   :  { %1025 = vmatprep.subr.bf16.mxu1 %v1143_v22  ;;  %v1180_v3 = vld [vmem:[#allocation5 + $0x130] sm:$0xff]   ;;  %v1182_v5 = vld [vmem:[#allocation5 + $0x178] sm:$0xff]   ;;  %v72_v9 = vld [vmem:[#allocation2 + $0x28] sm:$0xff] }
  0x4c   :  { %v1181_v4 = vld [vmem:[#allocation5 + $0x1b0] sm:$0xff]   ;;  %v1183_v6 = vld [vmem:[#allocation5 + $0x1f8] sm:$0xff]   ;;  %v80_v11 = vpack.c.bf16 %v72_v9, %v72_v9  ;;  %v71_v13 = vld [vmem:[#allocation2 + $0x20] sm:$0xff] }
  0x4d   :  { %1004 = vmatpush3.bf16.msra.mxu0 %v1144_v23  ;;  %v1184_v7 = vld [vmem:[#allocation5 + $0x138] sm:$0xff]   ;;  %v73_v14 = vld [vmem:[#allocation2 + $0x30] sm:$0xff]  ;;  %v211_v15 = vld [vmem:[%s1408_s1] sm:$0xff]  ;;  %v79_v16 = vpack.c.bf16 %v71_v13, %v71_v13 }
  0x4e   :  { %1026 = vmatpush3.bf16.msra.mxu1 %v1145_v24  ;;  %1005 = vmatprep.subr.bf16.mxu0 %v1146_v25  ;;  %v1185_v8 = vld [vmem:[#allocation5 + $0x1b8] sm:$0xff]   ;;  %v81_v17 = vpack.c.bf16 %v73_v14, %v73_v14  ;;  %v1186_v19 = vld [vmem:[#allocation7] sm:$0xff]   ;;  %v1187_v21 = vld [vmem:[#allocation7 + $0x8] sm:$0xff]  }
  0x4f   :  { %1027 = vmatprep.subr.bf16.mxu1 %v1147_v26  ;;  %v74_v10 = vld [vmem:[#allocation2 + $0x38] sm:$0xff]  ;;  %215 = vperm.xlu0 %1120, %v211_v15   ;;  %v1188_v22 = vld [vmem:[#allocation7 + $0x10] sm:$0xff]   ;;  %v1190_v24 = vld [vmem:[#allocation7 + $0x20] sm:$0xff]  }
  0x50   :  { %v82_v12 = vpack.c.bf16 %v74_v10, %v74_v10  ;;  %v1189_v23 = vld [vmem:[#allocation7 + $0x18] sm:$0xff]   ;;  %v1191_v25 = vld [vmem:[#allocation7 + $0x28] sm:$0xff]   ;;  %v1192_v26 = vld [vmem:[#allocation7 + $0x30] sm:$0xff]  }
  0x51   :  { %1006 = vmatpush3.bf16.msra.mxu0 %v1148_v27  ;;  %v1193_v27 = vld [vmem:[#allocation7 + $0x38] sm:$0xff]  }
  0x52   :  { %1028 = vmatpush3.bf16.msra.mxu1 %v1149_v28  ;;  %1007 = vmatprep.subr.bf16.mxu0 %v1150_v29  ;;  %v917_v28 = vld [vmem:[%s1410_s3] ss:$0 sm:$0xff] }
  0x53   :  { %1029 = vmatprep.subr.bf16.mxu1 %v1151_v30  ;;  %1121 = vset.pattern.permute.xlu0 %v1294_v18 }
  0x54   :  { %769 = vperm.xlu0 %1121, %v211_v15  }
  0x55   :  { %1008 = vmatpush3.bf16.msra.mxu0 %v1152_v31 }
  0x56   :  { %1030 = vmatpush3.bf16.msra.mxu1 %v1153_v32  ;;  %1037 = vmatprep.subr.bf16.mxu0 %v1154_v41 }
  0x57   :  { %1059 = vmatprep.subr.bf16.mxu1 %v1155_v42 }
  0x58   :  { %640 = vmatmul.mubr.bf16.vlgmr.msra.gmra.mrb[0].mxu0 %v75_v38 }
  0x59   :  { %680 = vmatmul.mubr.bf16.vlgmr.msra.gmra.mrb[0].mxu1 %v77_v40  ;;  %1038 = vmatpush3.bf16.msra.mxu0 %v1156_v43 }
  0x5a   :  { %1060 = vmatpush3.bf16.msra.mxu1 %v1157_v44  ;;  %1039 = vmatprep.subr.bf16.mxu0 %v1158_v45 }
  0x5b   :  { %1061 = vmatprep.subr.bf16.mxu1 %v1159_v46  ;;  %719 = vmatprep.mubr.bf16.mxu0 %v80_v11 }
  0x5c   :  { %759 = vmatprep.mubr.bf16.mxu1 %v82_v12 }
  0x5d   :  { %1040 = vmatpush3.bf16.msra.mxu0 %v1160_v47  ;;  %v982_v47 = vld [vmem:[%s1410_s3 + $0x1] ss:$0 sm:$0xff] }
  0x5e   :  { %1062 = vmatpush3.bf16.msra.mxu1 %v1161_v48  ;;  %1041 = vmatprep.subr.bf16.mxu0 %v1162_v49 }
  0x5f   :  { %1063 = vmatprep.subr.bf16.mxu1 %v1163_v50 }
  0x61   :  { %1042 = vmatpush3.bf16.msra.mxu0 %v1164_v51 }
  0x62   :  { %1064 = vmatpush3.bf16.msra.mxu1 %v1165_v52  ;;  %1043 = vmatprep.subr.bf16.mxu0 %v1166_v53 }
  0x63   :  { %1065 = vmatprep.subr.bf16.mxu1 %v1167_v54 }
  0x65   :  { %1044 = vmatpush3.bf16.msra.mxu0 %v1168_v55 }
  0x66   :  { %1066 = vmatpush3.bf16.msra.mxu1 %v1169_v56  ;;  %1045 = vmatprep.subr.bf16.mxu0 %v1170_v57 }
  0x67   :  { %1067 = vmatprep.subr.bf16.mxu1 %v1171_v58  ;;  %v983_v58 = vld [vmem:[%s1411_s4] ss:$0 sm:$0xff]  ;;  %s1260_s4 = scalar_lea.vmem %s908_s22, 64 }
  0x68   :  { %p1261_p10 = scmp.ne.s32.totalorder %s908_s22, %s1260_s4  ;;  %p1266_p12 = scmp.lt.s32.totalorder %s1260_s4, %s1260_s4 }
  0x69   :  { %1046 = vmatpush3.bf16.msra.mxu0 %v1172_v59 }
  0x6a   :  { %1068 = vmatpush3.bf16.msra.mxu1 %v1173_v60  ;;  %1047 = vmatprep.subr.bf16.mxu0 %v1174_v61  ;;  %p1267_p13 = por %p1266_p12, %p1265_p11 }
  0x6b   :  { %1069 = vmatprep.subr.bf16.mxu1 %v1175_v62 }
  0x6c   :  { %p1268_p0 = pnand %p1267_p13, %p1261_p10 }
  0x6d   :  { %1048 = vmatpush3.bf16.msra.mxu0 %v1176_v63  ;;  %v984_v63 = vld [vmem:[%s1413_s6] ss:$0 sm:$0xff] }
  0x6e   :  { %1070 = vmatpush3.bf16.msra.mxu1 %v1177_v0  ;;  %1049 = vmatprep.subr.bf16.mxu0 %v1178_v1 }
  0x6f   :  { %1071 = vmatprep.subr.bf16.mxu1 %v1179_v2 }
  0x71   :  { %1050 = vmatpush3.bf16.msra.mxu0 %v1180_v3 }
  0x72   :  { %1072 = vmatpush3.bf16.msra.mxu1 %v1181_v4  ;;  %1051 = vmatprep.subr.bf16.mxu0 %v1182_v5 }
  0x73   :  { %1073 = vmatprep.subr.bf16.mxu1 %v1183_v6 }
  0x75   :  { %1052 = vmatpush3.bf16.msra.mxu0 %v1184_v7 }
  0x76   :  { %1074 = vmatpush3.bf16.msra.mxu1 %v1185_v8  ;;  %1090 = vmatprep.subr.bf16.mxu0 %v1295_v20 }
  0x78   :  { %720 = vmatmul.mubr.bf16.vlgmr.msra.gmra.mrb[4].mxu0 %v79_v16 }
  0x79   :  { %760 = vmatmul.mubr.bf16.vlgmr.msra.gmra.mrb[4].mxu1 %v81_v17  ;;  %1091 = vmatpush3.bf16.msra.mxu0 %v1186_v19 }
  0x7a   :  { %1092 = vmatprep.subr.bf16.mxu0 %v1295_v20  ;;  %1106 = vmatprep.mubr.msk.bf16.mxu0 %vm1296_vm0, %v1295_v20 }
  0x7d   :  { %1093 = vmatpush3.bf16.msra.mxu0 %v1187_v21 }
  0x7e   :  { %1094 = vmatprep.subr.bf16.mxu0 %v1295_v20 }
  0x81   :  { %1095 = vmatpush3.bf16.msra.mxu0 %v1188_v22 }
  0x82   :  { %1096 = vmatprep.subr.bf16.mxu0 %v1295_v20 }
  0x85   :  { %1097 = vmatpush3.bf16.msra.mxu0 %v1189_v23 }
  0x86   :  { %1098 = vmatprep.subr.bf16.mxu0 %v1295_v20 }
  0x89   :  { %1099 = vmatpush3.bf16.msra.mxu0 %v1190_v24 }
  0x8a   :  { %1100 = vmatprep.subr.bf16.mxu0 %v1295_v20 }
  0x8d   :  { %1101 = vmatpush3.bf16.msra.mxu0 %v1191_v25 }
  0x8e   :  { %1102 = vmatprep.subr.bf16.mxu0 %v1295_v20 }
  0x91   :  { %1103 = vmatpush3.bf16.msra.mxu0 %v1192_v26 }
  0x92   :  { %1104 = vmatprep.subr.bf16.mxu0 %v1295_v20 }
  0x95   :  { %1105 = vmatpush3.bf16.msra.mxu0 %v1193_v27 }
  0xce   :  { %v216_v29 = vpop.permute.xlu0 %215 }
  0xcf   :  { %v222_v32 = vmul.f32 %v917_v28, %v216_v29 }
  0xd3   :  { %v770_v44 = vpop.permute.xlu0 %769 }
  0xd4   :  { %v776_v56 = vmul.f32 %v982_v47, %v770_v44 }
 0x12b   :  { %v1009_v30 = vpop.f32.mrb[0].mxu0 }
 0x12c   :  { %v1031_v31 = vpop.f32.mrb[0].mxu1  ;;  %v1010_v33 = vpop.f32.mrb[1].mxu0 }
 0x12d   :  { %v1032_v34 = vpop.f32.mrb[1].mxu1  ;;  %v1011_v35 = vadd.f32 %v1010_v33, %v1009_v30  ;;  %v1012_v37 = vpop.f32.mrb[2].mxu0 }
 0x12e   :  { %v1033_v36 = vadd.f32 %v1032_v34, %v1031_v31  ;;  %v1034_v38 = vpop.f32.mrb[2].mxu1  ;;  %v1013_v39 = vpop.f32.mrb[3].mxu0 }
 0x12f   :  { %v1035_v40 = vpop.f32.mrb[3].mxu1  ;;  %v642_v41 = vadd.f32 %v1011_v35, %v222_v32 }
 0x131   :  { %v682_v42 = vadd.f32 %v1033_v36, %v642_v41 }
 0x14b   :  { %v1053_v43 = vpop.f32.mrb[4].mxu0 }
 0x14c   :  { %v1075_v45 = vpop.f32.mrb[4].mxu1  ;;  %v1054_v46 = vpop.f32.mrb[5].mxu0 }
 0x14d   :  { %v1055_v48 = vadd.f32 %v1054_v46, %v1053_v43  ;;  %v1076_v49 = vpop.f32.mrb[5].mxu1  ;;  %v1056_v50 = vpop.f32.mrb[6].mxu0 }
 0x14e   :  { %v1077_v51 = vadd.f32 %v1076_v49, %v1075_v45  ;;  %v1078_v52 = vpop.f32.mrb[6].mxu1  ;;  %v1057_v53 = vpop.f32.mrb[7].mxu0 }
 0x14f   :  { %v722_v54 = vadd.f32 %v1055_v48, %v682_v42  ;;  %v1079_v55 = vpop.f32.mrb[7].mxu1 }
 0x151   :  { %v762_v57 = vadd.f32 %v1077_v51, %v722_v54 }
 0x153   :  { %v777_v59 = vadd.f32 %v776_v56, %v762_v57 }
 0x155   :  { %v785_v60 = vadd.f32 %v983_v58, %v777_v59 }
 0x157   :  { %v786_v61 = vmax.f32 %v785_v60, 0.0 }
 0x159   :  { %v787_v62 = vpack.c.bf16 %v786_v61, %v786_v61 }
 0x15b   :  { %1107 = vmatmul.mubr.bf16.vlgmr.msra.gmra.mrb[8].mxu0 %v787_v62 }
 0x22e   :  { %v893_v0 = vpop.f32.mrb[8].mxu0 }
 0x22f   :  { %v894_v1 = vadd.f32 %v984_v63, %v893_v0  ;;  %v1108_v2 = vpop.f32.mrb[9].mxu0 }
 0x230   :  { %v896_v3 = vpop.f32.mrb[10].mxu0 }
 0x231   :  { %v899_v4 = vpack.c.bf16 %v894_v1, %v894_v1  ;;  %v1109_v5 = vpop.f32.mrb[11].mxu0 }
 0x233   :  { %900 = vst [vmem:[#allocation8] sm:$0xf] %v899_v4 }
 0x234   :  { %1271 = shalt.err (!%p1268_p0)
}
 0x235   :  { %s1272_s6 = scalar_lea.hbm %s1414_s7, 64 }
 0x236   :  { %p1273_p1 = scmp.ne.s32.totalorder %s1414_s7, %s1272_s6  ;;  %p1276_p2 = scmp.lt.u32.totalorder %s1272_s6, %s1414_s7 }
 0x238   :  { %p1278_p3 = pnand %p1276_p2, %p1273_p1 }
 0x23a   :  { %1281 = shalt.err (!%p1278_p3)
}
 0x23b   :  { %910 = dma.vmem_to_hbm [thread:$0]  %s908_s22, 64, %s1414_s7, [#allocation4]  }
 0x23c   :  { %1286 = dma.done.wait [#allocation4], 64  }
 0x23d   :  { %1287 = vsyncadd [#allocation4], 4294967232 }
 0x23e   :  { %914 = vsyncpa [#allocation3], 1 }
 0x23f   :  { %915 = vsyncpa [#allocation6], 1 }
 0x240   :  { %916 = vsyncpa [#allocation4], 1 }

</bundles_post_ra>
